<compile_context>
chip_gen: v7x
topology: tpu7x:2x2x1
jax: 0.10.0
libtpu: 0.0.40
codegen_flags: <defaults>
</compile_context>

<pallas_src>
import functools

import jax
import jax.numpy as jnp
from jax import lax
from jax.experimental import pallas as pl
from jax.experimental.pallas import tpu as pltpu


def _basic_block_kernel(x_ref, w1_ref, w2_ref, bias_ref, out_ref,
                        *, N, C, H, W):
    """Whole BasicBlock (stride=1, identity shortcut) in one invocation.

    x_ref    : (N*C, H*W)        f32  NCHW input, flattened (free bitcast)
    w1_ref   : (N*C, 9*N*C)      f32  block-diag conv1 weights, bn1 scale folded
    w2_ref   : (N*C, 9*N*C)      f32  block-diag conv2 weights, bn2 scale folded
    bias_ref : (N*C, 2)          f32  col 0 = bn1 bias, col 1 = bn2 bias (per row)
    out_ref  : (N*C, H*W)        f32
    """
    NC = N * C
    HW = H * W

    # ---- halo masks from an in-kernel iota (no coords DMA) ------------------
    pix = lax.broadcasted_iota(jnp.int32, (NC, HW), 1)     # flat pixel id / lane
    if (W & (W - 1)) == 0:                                 # static python check
        xc = jnp.bitwise_and(pix, W - 1)                   # pix % W (W = 2^k)
    else:
        xc = pix % W
    m_up = pix >= W                    # row y-1 exists (dy = -1)
    m_down = pix < (H - 1) * W         # row y+1 exists (dy = +1)
    m_left = xc >= 1                   # col x-1 exists (dx = -1)
    m_right = xc < W - 1               # col x+1 exists (dx = +1)

    # Static per-tap metadata: flattened shift and halo mask (None == all valid).
    taps_meta = []
    for ky in range(3):
        dy = ky - 1
        for kx in range(3):
            dx = kx - 1
            my = m_up if dy < 0 else (m_down if dy > 0 else None)
            mx = m_left if dx < 0 else (m_right if dx > 0 else None)
            if my is None:
                mask = mx
            elif mx is None:
                mask = my
            else:
                mask = my & mx
            taps_meta.append((dy * W + dx, mask))

    def stacked_taps(v):
        """(NC, HW) slab -> (9*NC, HW) stack of the 9 shifted+masked taps."""
        parts = []
        for off, mask in taps_meta:
            # shifted[p] = v[p + off]; wrap-around is killed by the halo mask.
            sh = v if off == 0 else pltpu.roll(v, shift=(-off) % HW, axis=1)
            if mask is not None:
                sh = jnp.where(mask, sh, 0.0)
            parts.append(sh)
        return jnp.concatenate(parts, axis=0)

    x = x_ref[...]                     # (NC, HW) full slab (both images)
    b1 = bias_ref[:, 0:1]              # (NC, 1)
    b2 = bias_ref[:, 1:2]              # (NC, 1)

    # conv1 + bn1 + relu  (bn1 scale folded into w1 host-side)
    h = jnp.dot(w1_ref[...], stacked_taps(x),
                preferred_element_type=jnp.float32)
    h = jnp.maximum(h + b1, 0.0)

    # conv2 + bn2 + residual + relu   (single unmasked full-tile store)
    y = jnp.dot(w2_ref[...], stacked_taps(h),
                preferred_element_type=jnp.float32)
    out_ref[...] = jnp.maximum(y + (x + b2), 0.0)


def _fold_bn(gamma, beta, mean, var, eps=1e-5):
    scale = gamma / jnp.sqrt(var + eps)
    bias = beta - mean * scale
    return scale, bias


def _pack_block_diag(w_oihw, scale, N):
    """OIHW 3x3 weights (BN scale folded in) -> (N*C_out, 9*N*C_in) block-diag.

    blk[n*C_out + co, t*N*C_in + m*C_in + ci] = (n == m) * w[co, ci, t] * scale[co]
    which matches the (t, image, in_channel) row order of stacked_taps().
    """
    C_out, C_in = w_oihw.shape[0], w_oihw.shape[1]
    w = w_oihw.astype(jnp.float32) * scale[:, None, None, None]   # fold BN scale
    wt = w.reshape(C_out, C_in, 9).transpose(2, 0, 1)              # (t, co, ci)
    eye = jnp.eye(N, dtype=jnp.float32)
    blk = jnp.einsum('tok,nm->notmk', wt, eye)                     # (n,co,t,m,ci)
    return blk.reshape(N * C_out, 9 * N * C_in)


@jax.jit
def basic_block_forward(x_nchw, w1_oihw, bn1, w2_oihw, bn2):
    """x_nchw: (N, C, H, W) like PyTorch.  Returns (N, C, H, W)."""
    N, C, H, W = x_nchw.shape
    HW = H * W

    # NCHW -> (N*C, H*W): a free bitcast.  No pad, no transpose.
    x2d = x_nchw.astype(jnp.float32).reshape(N * C, HW)

    s1, b1 = _fold_bn(*bn1)
    s2, b2 = _fold_bn(*bn2)
    w1_blk = _pack_block_diag(w1_oihw, s1, N)
    w2_blk = _pack_block_diag(w2_oihw, s2, N)
    bias = jnp.stack([jnp.tile(b1, N), jnp.tile(b2, N)],
                     axis=1).astype(jnp.float32)                    # (N*C, 2)

    vmem = pl.BlockSpec(memory_space=pltpu.MemorySpace.VMEM)
    out2d = pl.pallas_call(
        functools.partial(_basic_block_kernel, N=N, C=C, H=H, W=W),
        out_shape=jax.ShapeDtypeStruct((N * C, HW), jnp.float32),
        in_specs=[vmem] * 4,
        out_specs=vmem,
    )(x2d, w1_blk, w2_blk, bias)

    return out2d.reshape(N, C, H, W)


def reference_forward(x_nchw, w1_oihw, bn1, w2_oihw, bn2):
    """Pure-JAX reference (NCHW convs) for correctness check."""
    dn = lax.conv_dimension_numbers(x_nchw.shape, w1_oihw.shape,
                                    ("NCHW", "OIHW", "NCHW"))

    def conv(x, w):
        return lax.conv_general_dilated(x, w, (1, 1), ((1, 1), (1, 1)),
                                        dimension_numbers=dn)

    def bn(x, params):
        s, b = _fold_bn(*params)
        return x * s[None, :, None, None] + b[None, :, None, None]

    out = jax.nn.relu(bn(conv(x_nchw, w1_oihw), bn1))
    out = bn(conv(out, w2_oihw), bn2)
    return jax.nn.relu(out + x_nchw)


if __name__ == "__main__":
    key = jax.random.PRNGKey(0)
    N, C, H, W = 2, 4, 16, 16          # inplanes = planes = 4, stride = 1
    ks = jax.random.split(key, 9)

    x = jax.random.normal(ks[0], (N, C, H, W), jnp.float32)
    w1 = jax.random.normal(ks[1], (C, C, 3, 3), jnp.float32) * 0.2
    w2 = jax.random.normal(ks[2], (C, C, 3, 3), jnp.float32) * 0.2
    bn1 = (jax.random.normal(ks[3], (C,)) * 0.1 + 1.0,            # gamma
           jax.random.normal(ks[4], (C,)) * 0.1,                  # beta
           jax.random.normal(ks[5], (C,)) * 0.1,                  # running_mean
           jnp.abs(jax.random.normal(ks[6], (C,))) * 0.1 + 1.0)   # running_var
    bn2 = (jax.random.normal(ks[7], (C,)) * 0.1 + 1.0,
           jax.random.normal(ks[8], (C,)) * 0.1,
           jnp.zeros((C,), jnp.float32),
           jnp.ones((C,), jnp.float32))

    out = basic_block_forward(x, w1, bn1, w2, bn2)
    out = jax.block_until_ready(out)

    ref = reference_forward(x, w1, bn1, w2, bn2)
    assert out.shape == (N, C, H, W)
    # Tolerance accounts for MXU f32-pass rounding and the changed summation
    # order of the stacked-tap contraction; structural bugs produce O(0.1+)
    # errors and are still caught.
    assert jnp.allclose(out, ref, atol=2e-2, rtol=2e-2), "mismatch vs reference"
    print("KERNEL_OK")
</pallas_src>

<mosaic_0001>
module attributes {stable_mosaic.version = 11 : i64} {
  func.func @_basic_block_kernel(%arg0: memref<8x256xf32, #tpu.memory_space<vmem>>, %arg1: memref<8x72xf32, #tpu.memory_space<vmem>>, %arg2: memref<8x72xf32, #tpu.memory_space<vmem>>, %arg3: memref<8x2xf32, #tpu.memory_space<vmem>>, %arg4: memref<8x256xf32, #tpu.memory_space<vmem>>) attributes {dimension_semantics = [], scalar_prefetch = 0 : i64, scratch_operands = 0 : i64, tpu.core_type = #tpu.core_type<tc>} {
    %0 = tpu.iota {dimensions = array<i32: 1>} : vector<8x256xi32>
    %c15_i32 = arith.constant 15 : i32
    %1 = vector.broadcast %c15_i32 : i32 to vector<8x256xi32>
    %2 = arith.andi %0, %1 : vector<8x256xi32>
    %c16_i32 = arith.constant 16 : i32
    %3 = vector.broadcast %c16_i32 : i32 to vector<8x256xi32>
    %4 = arith.cmpi sge, %0, %3 : vector<8x256xi32>
    %c240_i32 = arith.constant 240 : i32
    %5 = vector.broadcast %c240_i32 : i32 to vector<8x256xi32>
    %6 = arith.cmpi slt, %0, %5 : vector<8x256xi32>
    %c1_i32 = arith.constant 1 : i32
    %7 = vector.broadcast %c1_i32 : i32 to vector<8x256xi32>
    %8 = arith.cmpi sge, %2, %7 : vector<8x256xi32>
    %c15_i32_0 = arith.constant 15 : i32
    %9 = vector.broadcast %c15_i32_0 : i32 to vector<8x256xi32>
    %10 = arith.cmpi slt, %2, %9 : vector<8x256xi32>
    %11 = arith.andi %4, %8 : vector<8x256xi1>
    %12 = arith.andi %4, %10 : vector<8x256xi1>
    %13 = arith.andi %6, %8 : vector<8x256xi1>
    %14 = arith.andi %6, %10 : vector<8x256xi1>
    %c0 = arith.constant 0 : index
    %c0_1 = arith.constant 0 : index
    %15 = vector.load %arg0[%c0, %c0_1] : memref<8x256xf32, #tpu.memory_space<vmem>>, vector<8x256xf32>
    %c0_2 = arith.constant 0 : index
    %c0_3 = arith.constant 0 : index
    %16 = vector.load %arg3[%c0_2, %c0_3] : memref<8x2xf32, #tpu.memory_space<vmem>>, vector<8x1xf32>
    %c0_4 = arith.constant 0 : index
    %c1 = arith.constant 1 : index
    %17 = vector.load %arg3[%c0_4, %c1] : memref<8x2xf32, #tpu.memory_space<vmem>>, vector<8x1xf32>
    %c0_5 = arith.constant 0 : index
    %c0_6 = arith.constant 0 : index
    %18 = vector.load %arg1[%c0_5, %c0_6] : memref<8x72xf32, #tpu.memory_space<vmem>>, vector<8x72xf32>
    %c17_i32 = arith.constant 17 : i32
    %19 = tpu.dynamic_rotate %15 by %c17_i32 dim 1 : vector<8x256xf32>, i32 -> vector<8x256xf32>
    %cst = arith.constant 0.000000e+00 : f32
    %20 = vector.broadcast %cst : f32 to vector<8x256xf32>
    %21 = arith.select %11, %19, %20 : vector<8x256xi1>, vector<8x256xf32>
    %c16_i32_7 = arith.constant 16 : i32
    %22 = tpu.dynamic_rotate %15 by %c16_i32_7 dim 1 : vector<8x256xf32>, i32 -> vector<8x256xf32>
    %cst_8 = arith.constant 0.000000e+00 : f32
    %23 = vector.broadcast %cst_8 : f32 to vector<8x256xf32>
    %24 = arith.select %4, %22, %23 : vector<8x256xi1>, vector<8x256xf32>
    %c15_i32_9 = arith.constant 15 : i32
    %25 = tpu.dynamic_rotate %15 by %c15_i32_9 dim 1 : vector<8x256xf32>, i32 -> vector<8x256xf32>
    %cst_10 = arith.constant 0.000000e+00 : f32
    %26 = vector.broadcast %cst_10 : f32 to vector<8x256xf32>
    %27 = arith.select %12, %25, %26 : vector<8x256xi1>, vector<8x256xf32>
    %c1_i32_11 = arith.constant 1 : i32
    %28 = tpu.dynamic_rotate %15 by %c1_i32_11 dim 1 : vector<8x256xf32>, i32 -> vector<8x256xf32>
    %cst_12 = arith.constant 0.000000e+00 : f32
    %29 = vector.broadcast %cst_12 : f32 to vector<8x256xf32>
    %30 = arith.select %8, %28, %29 : vector<8x256xi1>, vector<8x256xf32>
    %c255_i32 = arith.constant 255 : i32
    %31 = tpu.dynamic_rotate %15 by %c255_i32 dim 1 : vector<8x256xf32>, i32 -> vector<8x256xf32>
    %cst_13 = arith.constant 0.000000e+00 : f32
    %32 = vector.broadcast %cst_13 : f32 to vector<8x256xf32>
    %33 = arith.select %10, %31, %32 : vector<8x256xi1>, vector<8x256xf32>
    %c241_i32 = arith.constant 241 : i32
    %34 = tpu.dynamic_rotate %15 by %c241_i32 dim 1 : vector<8x256xf32>, i32 -> vector<8x256xf32>
    %cst_14 = arith.constant 0.000000e+00 : f32
    %35 = vector.broadcast %cst_14 : f32 to vector<8x256xf32>
    %36 = arith.select %13, %34, %35 : vector<8x256xi1>, vector<8x256xf32>
    %c240_i32_15 = arith.constant 240 : i32
    %37 = tpu.dynamic_rotate %15 by %c240_i32_15 dim 1 : vector<8x256xf32>, i32 -> vector<8x256xf32>
    %cst_16 = arith.constant 0.000000e+00 : f32
    %38 = vector.broadcast %cst_16 : f32 to vector<8x256xf32>
    %39 = arith.select %6, %37, %38 : vector<8x256xi1>, vector<8x256xf32>
    %c239_i32 = arith.constant 239 : i32
    %40 = tpu.dynamic_rotate %15 by %c239_i32 dim 1 : vector<8x256xf32>, i32 -> vector<8x256xf32>
    %cst_17 = arith.constant 0.000000e+00 : f32
    %41 = vector.broadcast %cst_17 : f32 to vector<8x256xf32>
    %42 = arith.select %14, %40, %41 : vector<8x256xi1>, vector<8x256xf32>
    %43 = tpu.concatenate %21, %24, %27, %30, %15, %33, %36, %39, %42 in 0 : vector<8x256xf32>, vector<8x256xf32>, vector<8x256xf32>, vector<8x256xf32>, vector<8x256xf32>, vector<8x256xf32>, vector<8x256xf32>, vector<8x256xf32>, vector<8x256xf32> -> vector<72x256xf32>
    %cst_18 = arith.constant dense<0.000000e+00> : vector<8x256xf32>
    %44 = tpu.matmul %18, %43, %cst_18 {dimension_numbers = #tpu.dot_dimension_numbers<[1], [0], [0], [1], [0, 0, 1, 1], [], []>} : vector<8x72xf32>, vector<72x256xf32>, vector<8x256xf32> -> vector<8x256xf32>
    %45 = vector.broadcast %16 : vector<8x1xf32> to vector<8x256xf32>
    %46 = arith.addf %44, %45 : vector<8x256xf32>
    %cst_19 = arith.constant 0.000000e+00 : f32
    %47 = vector.broadcast %cst_19 : f32 to vector<8x256xf32>
    %48 = arith.maximumf %46, %47 : vector<8x256xf32>
    %c0_20 = arith.constant 0 : index
    %c0_21 = arith.constant 0 : index
    %49 = vector.load %arg2[%c0_20, %c0_21] : memref<8x72xf32, #tpu.memory_space<vmem>>, vector<8x72xf32>
    %c17_i32_22 = arith.constant 17 : i32
    %50 = tpu.dynamic_rotate %48 by %c17_i32_22 dim 1 : vector<8x256xf32>, i32 -> vector<8x256xf32>
    %cst_23 = arith.constant 0.000000e+00 : f32
    %51 = vector.broadcast %cst_23 : f32 to vector<8x256xf32>
    %52 = arith.select %11, %50, %51 : vector<8x256xi1>, vector<8x256xf32>
    %c16_i32_24 = arith.constant 16 : i32
    %53 = tpu.dynamic_rotate %48 by %c16_i32_24 dim 1 : vector<8x256xf32>, i32 -> vector<8x256xf32>
    %cst_25 = arith.constant 0.000000e+00 : f32
    %54 = vector.broadcast %cst_25 : f32 to vector<8x256xf32>
    %55 = arith.select %4, %53, %54 : vector<8x256xi1>, vector<8x256xf32>
    %c15_i32_26 = arith.constant 15 : i32
    %56 = tpu.dynamic_rotate %48 by %c15_i32_26 dim 1 : vector<8x256xf32>, i32 -> vector<8x256xf32>
    %cst_27 = arith.constant 0.000000e+00 : f32
    %57 = vector.broadcast %cst_27 : f32 to vector<8x256xf32>
    %58 = arith.select %12, %56, %57 : vector<8x256xi1>, vector<8x256xf32>
    %c1_i32_28 = arith.constant 1 : i32
    %59 = tpu.dynamic_rotate %48 by %c1_i32_28 dim 1 : vector<8x256xf32>, i32 -> vector<8x256xf32>
    %cst_29 = arith.constant 0.000000e+00 : f32
    %60 = vector.broadcast %cst_29 : f32 to vector<8x256xf32>
    %61 = arith.select %8, %59, %60 : vector<8x256xi1>, vector<8x256xf32>
    %c255_i32_30 = arith.constant 255 : i32
    %62 = tpu.dynamic_rotate %48 by %c255_i32_30 dim 1 : vector<8x256xf32>, i32 -> vector<8x256xf32>
    %cst_31 = arith.constant 0.000000e+00 : f32
    %63 = vector.broadcast %cst_31 : f32 to vector<8x256xf32>
    %64 = arith.select %10, %62, %63 : vector<8x256xi1>, vector<8x256xf32>
    %c241_i32_32 = arith.constant 241 : i32
    %65 = tpu.dynamic_rotate %48 by %c241_i32_32 dim 1 : vector<8x256xf32>, i32 -> vector<8x256xf32>
    %cst_33 = arith.constant 0.000000e+00 : f32
    %66 = vector.broadcast %cst_33 : f32 to vector<8x256xf32>
    %67 = arith.select %13, %65, %66 : vector<8x256xi1>, vector<8x256xf32>
    %c240_i32_34 = arith.constant 240 : i32
    %68 = tpu.dynamic_rotate %48 by %c240_i32_34 dim 1 : vector<8x256xf32>, i32 -> vector<8x256xf32>
    %cst_35 = arith.constant 0.000000e+00 : f32
    %69 = vector.broadcast %cst_35 : f32 to vector<8x256xf32>
    %70 = arith.select %6, %68, %69 : vector<8x256xi1>, vector<8x256xf32>
    %c239_i32_36 = arith.constant 239 : i32
    %71 = tpu.dynamic_rotate %48 by %c239_i32_36 dim 1 : vector<8x256xf32>, i32 -> vector<8x256xf32>
    %cst_37 = arith.constant 0.000000e+00 : f32
    %72 = vector.broadcast %cst_37 : f32 to vector<8x256xf32>
    %73 = arith.select %14, %71, %72 : vector<8x256xi1>, vector<8x256xf32>
    %74 = tpu.concatenate %52, %55, %58, %61, %48, %64, %67, %70, %73 in 0 : vector<8x256xf32>, vector<8x256xf32>, vector<8x256xf32>, vector<8x256xf32>, vector<8x256xf32>, vector<8x256xf32>, vector<8x256xf32>, vector<8x256xf32>, vector<8x256xf32> -> vector<72x256xf32>
    %cst_38 = arith.constant dense<0.000000e+00> : vector<8x256xf32>
    %75 = tpu.matmul %49, %74, %cst_38 {dimension_numbers = #tpu.dot_dimension_numbers<[1], [0], [0], [1], [0, 0, 1, 1], [], []>} : vector<8x72xf32>, vector<72x256xf32>, vector<8x256xf32> -> vector<8x256xf32>
    %76 = vector.broadcast %17 : vector<8x1xf32> to vector<8x256xf32>
    %77 = arith.addf %15, %76 : vector<8x256xf32>
    %78 = arith.addf %75, %77 : vector<8x256xf32>
    %cst_39 = arith.constant 0.000000e+00 : f32
    %79 = vector.broadcast %cst_39 : f32 to vector<8x256xf32>
    %80 = arith.maximumf %78, %79 : vector<8x256xf32>
    %c0_40 = arith.constant 0 : index
    %c0_41 = arith.constant 0 : index
    %81 = vector.load %arg4[%c0_40, %c0_41] : memref<8x256xf32, #tpu.memory_space<vmem>>, vector<8x256xf32>
    tpu.vector_store %arg4[%c0_40, %c0_41], %80 {strides = array<i32>} : memref<8x256xf32, #tpu.memory_space<vmem>>, vector<8x256xf32>,
    return
  }
}

</mosaic_0001>

<bundles_post_ra>
// kernel: tile.13
= control target key start
LH: loop header
LB: loop body
LE: loop exit
PB: predicated region body
PF: predicated region fallthrough
CT: control target
= control target key end

     0   :  { %s22_s0 = inlined_call_operand.vmem [shape: f32[4], index: 0, kind: input, shape index: {}]   ;;  %s23_s1 = inlined_call_operand.vmem [shape: f32[2,4], index: 1, kind: output, shape index: {}]  }
   0x1   :  { %v4_v0 = vld [vmem:[%s22_s0] ss:$0 sm:$0xff] }
   0x2   :  { %5 = vst [vmem:[%s23_s1] sm:$0x3] %v4_v0 }

// kernel: tile.18
= control target key start
LH: loop header
LB: loop body
LE: loop exit
PB: predicated region body
PF: predicated region fallthrough
CT: control target
= control target key end

     0   :  { %vm7_vm0 = vcmask 31744   ;;  %vm13_vm1 = vcmask 64544   ;;  %s39_s0 = inlined_call_operand.vmem [shape: f32[2,4], index: 0, kind: input, shape index: {}]   ;;  %s40_s1 = inlined_call_operand.vmem [shape: f32[8,1], index: 1, kind: output, shape index: {}]  }
   0x1   :  { %v4_v0 = vld [vmem:[%s39_s0] sm:$0x3]  ;;  %s22_s0 = smov 4  }
   0x2   :  { %5 = vst [vmem:[#allocation1] sm:$0x3] %v4_v0 }
   0x9   :  { %v10_v1 = vld [vmem:[#allocation1 + $0x1] sm:$0x1]   ;;  %v6_v2 = vld [vmem:[#allocation1] sm:$0x1]  }
   0xa   :  { %11 = vrot.lane.b32.xlu0 %v10_v1, %s22_s0  ;;  %8 = vst.msk [vmem:[#allocation0] sm:$0x1] %vm7_vm0, %v6_v2  }
  0x7c   :  { %v12_v3 = vpop.permute.xlu0 %11  }
  0x7d   :  { %14 = vst.msk [vmem:[#allocation0] sm:$0x1] %vm13_vm1, %v12_v3  }
  0x84   :  { %v18_v4 = vld [vmem:[#allocation0] sm:$0x1] }
  0x85   :  { %20 = vst [vmem:[%s40_s1] sm:$0x1] %v18_v4 }

// kernel: basic_block_forward.1
= control target key start
LH: loop header
LB: loop body
LE: loop exit
PB: predicated region body
PF: predicated region fallthrough
CT: control target
= control target key end

     0   :  { %s512_s19 = smov 15   ;;  %s513_s20 = smov 17   ;;  %v520_v3 = vmov 0.0   ;;  %v521_v4 = vmov 0   ;;  %v17_v6 = vlaneseq  ;;  %vm522_vm9 = vmmov 1   ;;  %s838_s0 = inlined_call_operand.vmem [shape: f32[8,256], index: 0, kind: input, shape index: {}]   ;;  %s839_s3 = inlined_call_operand.vmem [shape: f32[8,2], index: 3, kind: input, shape index: {}]   ;;  %s840_s1 = inlined_call_operand.vmem [shape: f32[8,72], index: 1, kind: input, shape index: {}]   ;;  %s841_s2 = inlined_call_operand.vmem [shape: f32[8,72], index: 2, kind: input, shape index: {}]   ;;  %s842_s4 = inlined_call_operand.vmem [shape: f32[8,256], index: 4, kind: output, shape index: {}]  }
   0x1   :  { %v552_v0 = vld [vmem:[%s838_s0] sm:$0xff]  ;;  %v557_v1 = vld [vmem:[%s838_s0 + $0x8] sm:$0xff]  ;;  %s514_s21 = smov 1   ;;  %s515_s22 = smov 16   ;;  %187 = vmatprep.mubr.f32.mxu0 %v520_v3  ;;  %334 = vmatprep.mubr.f32.mxu1 %v520_v3 }
   0x2   :  { %v449_v2 = vpack.i.bf16 %v557_v1, %v552_v0  ;;  %s516_s23 = smov 127   ;;  %s517_s0 = smov 113   ;;  %474 = vset.pattern.permute.xlu1 %v521_v4  ;;  %v573_v5 = vld [vmem:[%s839_s3] sm:$0xff]  ;;  %v578_v7 = vand.u32 127, %v17_v6 }
   0x3   :  { %s518_s24 = smov 112   ;;  %s519_s25 = smov 111   ;;  %v196_v62 = vld [vmem:[%s841_s2] sm:$0xff] }
   0x4   :  { %450 = vrot.lane.b32.xlu1 %v449_v2, %s512_s19  ;;  %440 = vrot.lane.b32.xlu0 %v449_v2, %s513_s20  ;;  %v581_v8 = vadd.s32 128, %v578_v7  ;;  %v20_v9 = vand.u32 15, %v578_v7  ;;  %vm22_vm0 = vcmp.ge.s32.totalorder %v578_v7, 16  ;;  %vm843_vm2 = vcmp.lt.s32.totalorder %v578_v7, 15 }
   0x5   :  { %vm46_vm4 = vcmp.lt.s32.totalorder %v578_v7, 17  ;;  %vm844_vm5 = vcmp.lt.s32.totalorder %v578_v7, 1  ;;  %vm847_vm6 = vcmp.lt.s32.totalorder %v578_v7, 16  ;;  %vm845_vm13 = vcmp.lt.s32.totalorder %v578_v7, 127 }
   0x6   :  { %v21_v10 = vand.u32 15, %v581_v8  ;;  %vm586_vm1 = vcmp.ge.s32.totalorder %v20_v9, 1  ;;  %vm621_vm11 = vcmp.lt.s32.totalorder %v20_v9, 15 }
   0x7   :  { %vm602_vm7 = vmand %vm22_vm0, %vm586_vm1 }
   0x8   :  { %455 = vrot.lane.b32.xlu1 %v449_v2, %s514_s21  ;;  %445 = vrot.lane.b32.xlu0 %v449_v2, %s515_s22  ;;  %vm591_vm3 = vcmp.ge.s32.totalorder %v21_v10, 1  ;;  %vm606_vm8 = vcmp.lt.s32.totalorder %v21_v10, 15  ;;  %vm637_vm12 = vmpackc.low %vm22_vm0, %vm602_vm7  ;;  %vm850_vm7 = vcmp.lt.s32.totalorder %v578_v7, 113 }
   0x9   :  { %vm617_vm10 = vmpackc.low %vm522_vm9, %vm591_vm3 }
   0xa   :  { %vm846_vm14 = vmpackc.low %vm591_vm3, %vm606_vm8 }
   0xb   :  { %vm650_vm15 = vmand %vm22_vm0, %vm621_vm11  ;;  %vm25_vm0 = vcmp.lt.s32.totalorder %v581_v8, 240 }
   0xc   :  { %460 = vrot.lane.b32.xlu0 %v449_v2, %s516_s23  ;;  %465 = vrot.lane.b32.xlu1 %v449_v2, %s517_s0 }
  0x10   :  { %470 = vrot.lane.b32.xlu0 %v449_v2, %s518_s24  ;;  %105 = vrot.lane.b32.xlu1 %v552_v0, %s519_s25 }
  0x14   :  { %107 = vrot.lane.b32.xlu0 %v557_v1, %s519_s25  ;;  %116 = vperm.xlu1 %474, %v573_v5  }
  0x76   :  { %v451_v11 = vpop.permute.xlu1 %450  ;;  %v441_v12 = vpop.permute.xlu0 %440 }
  0x77   :  { %v453_v14 = vunpack.i.h.bf16 %v451_v11  ;;  %v452_v15 = vunpack.i.l.bf16 %v451_v11  ;;  %v443_v16 = vunpack.i.h.bf16 %v441_v12  ;;  %v442_v17 = vunpack.i.l.bf16 %v441_v12  ;;  %v41_v12 = vld [vmem:[%s840_s1] sm:$0xff] }
  0x79   :  { %v65_v27 = vsel %vm843_vm2, %v452_v15, %v453_v14  ;;  %v47_v28 = vsel %vm46_vm4, %v442_v17, %v443_v16  ;;  %v48_v33 = vsel %vm46_vm4, %v443_v16, %v442_v17  ;;  %v66_v45 = vsel %vm843_vm2, %v453_v14, %v452_v15  ;;  %vm848_vm2 = vmpackc.low %vm586_vm1, %vm650_vm15 }
  0x7a   :  { %v456_v19 = vpop.permute.xlu1 %455  ;;  %v446_v20 = vpop.permute.xlu0 %445 }
  0x7b   :  { %v458_v23 = vunpack.i.h.bf16 %v456_v19  ;;  %v457_v24 = vunpack.i.l.bf16 %v456_v19  ;;  %v448_v25 = vunpack.i.h.bf16 %v446_v20  ;;  %v447_v26 = vunpack.i.l.bf16 %v446_v20 }
  0x7d   :  { %v74_v31 = vsel %vm844_vm5, %v457_v24, %v458_v23  ;;  %v56_v32 = vsel %vm847_vm6, %v447_v26, %v448_v25  ;;  %v57_v34 = vsel %vm847_vm6, %v448_v25, %v447_v26  ;;  %v75_v46 = vsel %vm844_vm5, %v458_v23, %v457_v24  ;;  %vm709_vm6 = vmpackc.low %vm621_vm11, %vm522_vm9 }
  0x7e   :  { %v379_v36 = vpack.c.bf16 %v56_v32, %v47_v28  ;;  %v382_v37 = vpack.c.bf16 %v57_v34, %v48_v33  ;;  %v461_v38 = vpop.permute.xlu0 %460  ;;  %v466_v39 = vpop.permute.xlu1 %465  ;;  %v385_v47 = vpack.c.bf16 %v74_v31, %v65_v27  ;;  %vm849_vm5 = vcmp.lt.s32.totalorder %v578_v7, 112 }
  0x7f   :  { %v463_v40 = vunpack.i.h.bf16 %v461_v38  ;;  %v462_v41 = vunpack.i.l.bf16 %v461_v38  ;;  %v468_v43 = vunpack.i.h.bf16 %v466_v39  ;;  %v467_v44 = vunpack.i.l.bf16 %v466_v39 }
  0x80   :  { %381 = vmatprep.subr.msk.bf16.mxu0 %vm617_vm10, %v379_v36  ;;  %v388_v52 = vpack.c.bf16 %v75_v46, %v66_v45  ;;  %v523_v23 = vmov 1  }
  0x81   :  { %384 = vmatpush1.bf16.msk.msra.mxu0 %vm637_vm12, %v382_v37  ;;  %v84_v48 = vsel %vm845_vm13, %v463_v40, %v462_v41  ;;  %v83_v49 = vsel %vm845_vm13, %v462_v41, %v463_v40  ;;  %v93_v53 = vsel %vm850_vm7, %v468_v43, %v467_v44  ;;  %vm684_vm13 = vmpackc.low %vm606_vm8, %vm522_vm9  ;;  %v92_v59 = vsel %vm850_vm7, %v467_v44, %v468_v43 }
  0x82   :  { %v391_v50 = vpack.c.bf16 %v84_v48, %v557_v1  ;;  %387 = vmatprep.subr.msk.bf16.mxu0 %vm846_vm14, %v385_v47  ;;  %v471_v51 = vpop.permute.xlu0 %470  ;;  %vm35_vm14 = vmand %vm25_vm0, %vm591_vm3  ;;  %v394_v57 = vpack.c.bf16 %v83_v49, %v552_v0  ;;  %v106_v2 = vpop.permute.xlu1 %105  ;;  %510 = vset.pattern.permute.xlu1 %v523_v23 }
  0x83   :  { %v473_v54 = vunpack.i.h.bf16 %v471_v51  ;;  %v472_v55 = vunpack.i.l.bf16 %v471_v51  ;;  %vm727_vm7 = vmpackc.low %vm522_vm9, %vm586_vm1  ;;  %vm851_vm9 = vcmask 588800   ;;  %511 = vset.pattern.permute.xlu0 %v523_v23 }
  0x85   :  { %390 = vmatpush1.bf16.msk.msra.mxu0 %vm848_vm2, %v388_v52  ;;  %v102_v58 = vsel %vm849_vm5, %v473_v54, %v472_v55  ;;  %v101_v60 = vsel %vm849_vm5, %v472_v55, %v473_v54  ;;  %vm715_vm2 = vmpackc.low %vm25_vm0, %vm35_vm14  ;;  %vm852_vm5 = vcmp.lt.s32.totalorder %v578_v7, 111 }
  0x86   :  { %v397_v61 = vpack.c.bf16 %v102_v58, %v93_v53  ;;  %393 = vmatprep.subr.msk.bf16.mxu0 %vm684_vm13, %v391_v50  ;;  %v108_v3 = vpop.permute.xlu0 %107  ;;  %v400_v4 = vpack.c.bf16 %v101_v60, %v92_v59  ;;  %vm737_vm14 = vmand %vm25_vm0, %vm606_vm8  ;;  %vm879_vm0 = vcmp.lt.s32.totalorder %v578_v7, 16 }
  0x87   :  { %v111_v9 = vsel %vm852_vm5, %v108_v3, %v106_v2  ;;  %v110_v11 = vsel %vm852_vm5, %v106_v2, %v108_v3  ;;  %vm881_vm5 = vcmp.lt.s32.totalorder %v578_v7, 1 }
  0x89   :  { %396 = vmatpush1.bf16.msk.msra.mxu0 %vm709_vm6, %v394_v57 }
  0x8a   :  { %399 = vmatprep.subr.msk.bf16.mxu0 %vm715_vm2, %v397_v61 }
  0x8d   :  { %402 = vmatpush1.bf16.msk.msra.mxu0 %vm727_vm7, %v400_v4 }
  0x8e   :  { %361 = vmatprep.subr.msk.mxu0 %vm737_vm14, %v111_v9 }
  0x91   :  { %362 = vmatpush1.msk.msra.mxu0 %vm621_vm11, %v110_v11 }
  0x92   :  { %363 = vmatmul.mubr.msk.f32.vlgmr.msra.gmra.mrb[0].mxu0 %vm851_vm9, %v41_v12  ;;  %vm880_vm9 = vmmov %vm879_vm0 }
  0x93   :  { %v117_v8 = vpop.permute.xlu1 %116 }
 0x165   :  { %v189_v14 = vpop.f32.mrb[0].mxu0 }
 0x166   :  { %v190_v15 = vadd.f32 %v189_v14, %v117_v8  ;;  %v191_v16 = vpop.f32.mrb[1].mxu0 }
 0x167   :  { %v192_v17 = vadd.f32 %v191_v16, %v117_v8 }
 0x168   :  { %v753_v19 = vmax.f32 %v190_v15, 0.0 }
 0x169   :  { %v195_v20 = vmax.f32 %v192_v17, 0.0 }
 0x16b   :  { %v480_v21 = vpack.i.bf16 %v195_v20, %v753_v19 }
 0x16d   :  { %481 = vrot.lane.b32.xlu1 %v480_v21, %s515_s22  ;;  %476 = vrot.lane.b32.xlu0 %v480_v21, %s513_s20 }
 0x171   :  { %491 = vrot.lane.b32.xlu1 %v480_v21, %s514_s21  ;;  %486 = vrot.lane.b32.xlu0 %v480_v21, %s512_s19 }
 0x175   :  { %501 = vrot.lane.b32.xlu1 %v480_v21, %s517_s0  ;;  %496 = vrot.lane.b32.xlu0 %v480_v21, %s516_s23 }
 0x179   :  { %253 = vrot.lane.b32.xlu1 %v753_v19, %s519_s25  ;;  %506 = vrot.lane.b32.xlu0 %v480_v21, %s518_s24 }
 0x17d   :  { %255 = vrot.lane.b32.xlu0 %v195_v20, %s519_s25  ;;  %262 = vperm.xlu1 %510, %v573_v5  }
 0x1df   :  { %v482_v24 = vpop.permute.xlu1 %481  ;;  %v477_v25 = vpop.permute.xlu0 %476 }
 0x1e0   :  { %v484_v26 = vunpack.i.h.bf16 %v482_v24  ;;  %v483_v27 = vunpack.i.l.bf16 %v482_v24  ;;  %v479_v28 = vunpack.i.h.bf16 %v477_v25  ;;  %v478_v31 = vunpack.i.l.bf16 %v477_v25 }
 0x1e2   :  { %v201_v32 = vsel %vm46_vm4, %v478_v31, %v479_v28  ;;  %v209_v33 = vsel %vm879_vm0, %v483_v27, %v484_v26  ;;  %v202_v34 = vsel %vm46_vm4, %v479_v28, %v478_v31  ;;  %v210_v36 = vsel %vm880_vm9, %v484_v26, %v483_v27  ;;  %vm882_vm0 = vmmov %vm881_vm5 }
 0x1e3   :  { %v492_v37 = vpop.permute.xlu1 %491  ;;  %v487_v5 = vpop.permute.xlu0 %486  ;;  %v403_v38 = vpack.c.bf16 %v209_v33, %v201_v32  ;;  %v406_v39 = vpack.c.bf16 %v210_v36, %v202_v34  ;;  %vm883_vm4 = vcmp.lt.s32.totalorder %v578_v7, 15 }
 0x1e4   :  { %v494_v40 = vunpack.i.h.bf16 %v492_v37  ;;  %v493_v41 = vunpack.i.l.bf16 %v492_v37  ;;  %v489_v43 = vunpack.i.h.bf16 %v487_v5  ;;  %v488_v44 = vunpack.i.l.bf16 %v487_v5  ;;  %vm884_vm9 = vmmov %vm883_vm4 }
 0x1e5   :  { %405 = vmatprep.subr.msk.bf16.mxu1 %vm617_vm10, %v403_v38  ;;  %vm886_vm10 = vcmp.lt.s32.totalorder %v578_v7, 127 }
 0x1e6   :  { %v225_v45 = vsel %vm881_vm5, %v493_v41, %v494_v40  ;;  %v226_v46 = vsel %vm882_vm0, %v494_v40, %v493_v41  ;;  %v217_v47 = vsel %vm883_vm4, %v488_v44, %v489_v43  ;;  %v218_v48 = vsel %vm884_vm9, %v489_v43, %v488_v44  ;;  %408 = vmatpush1.bf16.msk.msra.mxu1 %vm637_vm12, %v406_v39  ;;  %vm885_vm5 = vmpackc.low %vm591_vm3, %vm606_vm8 }
 0x1e7   :  { %v409_v49 = vpack.c.bf16 %v225_v45, %v217_v47  ;;  %v412_v50 = vpack.c.bf16 %v226_v46, %v218_v48  ;;  %v502_v51 = vpop.permute.xlu1 %501  ;;  %v497_v29 = vpop.permute.xlu0 %496  ;;  %vm887_vm0 = vmmov %vm886_vm10  ;;  %vm889_vm3 = vcmp.lt.s32.totalorder %v578_v7, 113  ;;  %vm891_vm4 = vcmp.lt.s32.totalorder %v578_v7, 112 }
 0x1e8   :  { %v499_v52 = vunpack.i.h.bf16 %v497_v29  ;;  %v498_v53 = vunpack.i.l.bf16 %v497_v29  ;;  %v504_v54 = vunpack.i.h.bf16 %v502_v51  ;;  %v503_v55 = vunpack.i.l.bf16 %v502_v51  ;;  %vm888_vm12 = vmpackc.low %vm586_vm1, %vm650_vm15 }
 0x1e9   :  { %411 = vmatprep.subr.msk.bf16.mxu1 %vm885_vm5, %v409_v49  ;;  %vm890_vm8 = vmmov %vm889_vm3 }
 0x1ea   :  { %v233_v57 = vsel %vm886_vm10, %v498_v53, %v499_v52  ;;  %v234_v35 = vsel %vm887_vm0, %v499_v52, %v498_v53  ;;  %414 = vmatpush1.bf16.msk.msra.mxu1 %vm888_vm12, %v412_v50  ;;  %v241_v61 = vsel %vm889_vm3, %v503_v55, %v504_v54  ;;  %v242_v2 = vsel %vm890_vm8, %v504_v54, %v503_v55  ;;  %vm892_vm1 = vmmov %vm891_vm4 }
 0x1eb   :  { %v415_v58 = vpack.c.bf16 %v234_v35, %v195_v20  ;;  %v418_v18 = vpack.c.bf16 %v233_v57, %v753_v19  ;;  %v507_v22 = vpop.permute.xlu0 %506  ;;  %v254_v56 = vpop.permute.xlu1 %253 }
 0x1ec   :  { %v509_v59 = vunpack.i.h.bf16 %v507_v22  ;;  %v508_v60 = vunpack.i.l.bf16 %v507_v22 }
 0x1ed   :  { %417 = vmatprep.subr.msk.bf16.mxu1 %vm684_vm13, %v415_v58  ;;  %vm893_vm13 = vcmp.lt.s32.totalorder %v578_v7, 111 }
 0x1ee   :  { %v249_v13 = vsel %vm891_vm4, %v508_v60, %v509_v59  ;;  %v250_v42 = vsel %vm892_vm1, %v509_v59, %v508_v60  ;;  %420 = vmatpush1.bf16.msk.msra.mxu1 %vm709_vm6, %v418_v18  ;;  %vm894_vm6 = vmmov %vm893_vm13 }
 0x1ef   :  { %v421_v3 = vpack.c.bf16 %v250_v42, %v242_v2  ;;  %v424_v4 = vpack.c.bf16 %v249_v13, %v241_v61  ;;  %v256_v9 = vpop.permute.xlu0 %255 }
 0x1f0   :  { %v258_v11 = vsel %vm893_vm13, %v256_v9, %v254_v56  ;;  %v257_v12 = vsel %vm894_vm6, %v254_v56, %v256_v9 }
 0x1f1   :  { %423 = vmatprep.subr.msk.bf16.mxu1 %vm715_vm2, %v421_v3  ;;  %vm895_vm2 = vcmask 588800  }
 0x1f2   :  { %426 = vmatpush1.bf16.msk.msra.mxu1 %vm727_vm7, %v424_v4 }
 0x1f3   :  { %376 = vmatprep.subr.msk.mxu1 %vm737_vm14, %v258_v11 }
 0x1f6   :  { %377 = vmatpush1.msk.msra.mxu1 %vm621_vm11, %v257_v12 }
 0x1f7   :  { %378 = vmatmul.mubr.msk.f32.vlgmr.msra.gmra.mrb[0].mxu1 %vm895_vm2, %v196_v62 }
 0x1fc   :  { %v263_v63 = vpop.permute.xlu1 %262 }
 0x1fd   :  { %v265_v8 = vadd.f32 %v263_v63, %v552_v0  ;;  %v266_v6 = vadd.f32 %v263_v63, %v557_v1 }
 0x2ca   :  { %v336_v14 = vpop.f32.mrb[0].mxu1 }
 0x2cb   :  { %v337_v10 = vadd.f32 %v336_v14, %v265_v8  ;;  %v338_v15 = vpop.f32.mrb[1].mxu1 }
 0x2cc   :  { %v339_v16 = vadd.f32 %v338_v15, %v266_v6 }
 0x2cd   :  { %v341_v17 = vmax.f32 %v337_v10, 0.0 }
 0x2ce   :  { %v342_v19 = vmax.f32 %v339_v16, 0.0 }
 0x2cf   :  { %343 = vst [vmem:[%s842_s4] sm:$0xff] %v341_v17 }
 0x2d0   :  { %344 = vst [vmem:[%s842_s4 + $0x8] sm:$0xff] %v342_v19 }

</bundles_post_ra>
